<compile_context>
chip_gen: v7x
topology: tpu7x:2x2x1
jax: 0.10.0
libtpu: 0.0.40
codegen_flags: <defaults>
</compile_context>

<pallas_src>
import functools

import jax
import jax.numpy as jnp
from jax import lax
from jax.experimental import pallas as pl
from jax.experimental.pallas import tpu as pltpu


# dot_general dimension numbers for  y = x @ W.T  with W in PyTorch
# (out_features, in_features) orientation: contract x's last axis with W's
# last axis, no batch dims.  Result is (batch_tile, out_features).
_DN_XWT = (((1,), (1,)), ((), ()))


def _reinforce_kernel(x_ref, w1_ref, b1_ref, w2_ref, b2_ref, w3_ref, b3_ref,
                      o_ref):
    """Fully fused hot path: 3 MXU matmuls + 2 ReLUs + softmax on one tile."""
    cdt = w1_ref.dtype                        # MXU input dtype (f32 or bf16)
    x = x_ref[...].astype(cdt)                # (Bt, D); ob.float()/bf16 cast

    # relu(self.inp(ob))  ->  (Bt, H1)
    h1 = lax.dot_general(x, w1_ref[...], _DN_XWT,
                         preferred_element_type=jnp.float32)
    h1 = jnp.maximum(h1 + b1_ref[...], 0.0)   # bias + ReLU stay f32

    # relu(self.int(out)) ->  (Bt, H2)
    h2 = lax.dot_general(h1.astype(cdt), w2_ref[...], _DN_XWT,
                         preferred_element_type=jnp.float32)
    h2 = jnp.maximum(h2 + b2_ref[...], 0.0)

    # self.out(out)       ->  (Bt, A)
    logits = lax.dot_general(h2.astype(cdt), w3_ref[...], _DN_XWT,
                             preferred_element_type=jnp.float32)
    logits = logits + b3_ref[...]

    # Numerically stable softmax over actions (matches nn.Softmax(dim=-1)).
    # Exact divide so each row sums to 1 within f32 rounding.
    m = jnp.max(logits, axis=-1, keepdims=True)
    e = jnp.exp(logits - m)
    denom = jnp.sum(e, axis=-1, keepdims=True)
    o_ref[...] = (e / denom).astype(o_ref.dtype)


def _round_up(v, m):
    return (v + m - 1) // m * m


@functools.partial(jax.jit, static_argnames=("batch_tile", "use_bf16"))
def reinforce_forward(x, params, *, batch_tile=8192, use_bf16=True):
    """REINFORCE_Model forward via one fused Pallas kernel.

    x: (B, size_ob) or (size_ob,) observations (f32 or bf16).
    params: dict with w1 (H1,D), w2 (H2,H1), w3 (A,H2) in PyTorch
            (out_features, in_features) layout and biases b1/b2/b3 of shape
            (H,), (H,1) or (1,H).
    Returns (B, size_action) (or (size_action,)) f32 action probabilities.
    """
    squeeze = x.ndim == 1
    if squeeze:
        x = x[None, :]

    B, D = x.shape
    # ob.float(): keep f32 unless the caller already streams bf16 observations.
    if x.dtype != jnp.float32 and x.dtype != jnp.bfloat16:
        x = x.astype(jnp.float32)

    cdt = jnp.bfloat16 if use_bf16 else jnp.float32
    w1 = params["w1"].astype(cdt)
    w2 = params["w2"].astype(cdt)
    w3 = params["w3"].astype(cdt)
    b1 = params["b1"].astype(jnp.float32).reshape(1, -1)
    b2 = params["b2"].astype(jnp.float32).reshape(1, -1)
    b3 = params["b3"].astype(jnp.float32).reshape(1, -1)

    H1 = w1.shape[0]
    H2 = w2.shape[0]
    A = w3.shape[0]

    # Batch (M) tile: multiple of 256 (MXU-friendly on all generations, and a
    # multiple of the 8-sublane quantum).  Clamp so small batches use a small
    # tile and large batches get at least ~4 grid steps before hitting the
    # requested maximum tile.
    TILE_Q = 256
    bt = min(batch_tile, _round_up(pl.cdiv(B, 4), TILE_Q))
    bt = _round_up(max(bt, TILE_Q), TILE_Q)
    n_tiles = pl.cdiv(B, bt)                  # ragged last block handled by Pallas

    # Scoped-VMEM budget: double-buffered x/out tiles + live f32 intermediates
    # + resident params, with 2x headroom; capped at 48 MiB (fits v7x's 64 MiB
    # physical VMEM, above the v5e/v6e scoped defaults).
    x_item = 2 if x.dtype == jnp.bfloat16 else 4
    vmem_est = (2 * bt * (D * x_item + A * 4)
                + bt * (H1 + H2 + 2 * A) * 4
                + 4 * (H1 * D + H2 * H1 + A * H2 + H1 + H2 + A) * 4)
    vmem_limit = int(min(max(2 * vmem_est, 16 * 2 ** 20), 48 * 2 ** 20))

    in_specs = [
        pl.BlockSpec((bt, D), lambda i: (i, 0)),     # x: streamed batch tile
        # Weights/biases: constant index maps -> fetched once, stay resident.
        pl.BlockSpec((H1, D), lambda i: (0, 0)),     # w1
        pl.BlockSpec((1, H1), lambda i: (0, 0)),     # b1
        pl.BlockSpec((H2, H1), lambda i: (0, 0)),    # w2
        pl.BlockSpec((1, H2), lambda i: (0, 0)),     # b2
        pl.BlockSpec((A, H2), lambda i: (0, 0)),     # w3
        pl.BlockSpec((1, A), lambda i: (0, 0)),      # b3
    ]
    out_specs = pl.BlockSpec((bt, A), lambda i: (i, 0))

    out = pl.pallas_call(
        _reinforce_kernel,
        out_shape=jax.ShapeDtypeStruct((B, A), jnp.float32),
        grid_spec=pltpu.PrefetchScalarGridSpec(
            num_scalar_prefetch=0,
            grid=(n_tiles,),
            in_specs=in_specs,
            out_specs=out_specs,
        ),
        compiler_params=pltpu.CompilerParams(
            # Batch tiles are independent; on v7x the 2 TensorCores can split
            # the batch axis.  (CORE_PARALLEL considered; "parallel" kept for
            # portability across 1-TC v5e/v6e.)
            dimension_semantics=("parallel",),
            vmem_limit_bytes=vmem_limit,
        ),
    )(x, w1, b1, w2, b2, w3, b3)

    return out[0] if squeeze else out


def init_params(key, size_ob, hidden1, hidden2, size_action):
    """PyTorch-style uniform(+/-1/sqrt(fan_in)) init; weights in (out, in)."""
    def linear(key, fan_in, fan_out):
        kw, kb = jax.random.split(key)
        bound = 1.0 / jnp.sqrt(jnp.float32(fan_in))
        w = jax.random.uniform(kw, (fan_out, fan_in), jnp.float32,
                               minval=-bound, maxval=bound)
        b = jax.random.uniform(kb, (1, fan_out), jnp.float32,
                               minval=-bound, maxval=bound)
        return w, b

    k1, k2, k3 = jax.random.split(key, 3)
    w1, b1 = linear(k1, size_ob, hidden1)
    w2, b2 = linear(k2, hidden1, hidden2)
    w3, b3 = linear(k3, hidden2, size_action)
    return {"w1": w1, "b1": b1, "w2": w2, "b2": b2, "w3": w3, "b3": b3}


def reference_forward(x, params):
    """Pure-JAX reference of the PyTorch forward (f32, highest precision)."""
    hi = lax.Precision.HIGHEST
    x = x.astype(jnp.float32)
    h1 = jax.nn.relu(jnp.dot(x, params["w1"].T, precision=hi)
                     + params["b1"].reshape(-1))
    h2 = jax.nn.relu(jnp.dot(h1, params["w2"].T, precision=hi)
                     + params["b2"].reshape(-1))
    logits = jnp.dot(h2, params["w3"].T, precision=hi) + params["b3"].reshape(-1)
    return jax.nn.softmax(logits, axis=-1)


if __name__ == "__main__":
    # REINFORCE policy MLP shapes (small, consistent with the module).
    SIZE_OB = 16        # size_ob
    HIDDEN_1 = 32       # hyperParams.HIDDEN_SIZE_1
    HIDDEN_2 = 32       # hyperParams.HIDDEN_SIZE_2
    SIZE_ACTION = 8     # size_action

    key = jax.random.PRNGKey(0)
    k_params, k_x1, k_x2 = jax.random.split(key, 3)
    params = init_params(k_params, SIZE_OB, HIDDEN_1, HIDDEN_2, SIZE_ACTION)

    # Case 1: default path (bf16 MXU inputs, f32 accumulation/softmax).
    # B=512 -> tile 256, 2 parallel grid steps.
    B1 = 512
    x1 = jax.random.normal(k_x1, (B1, SIZE_OB), jnp.float32)
    out1 = jax.block_until_ready(reinforce_forward(x1, params))
    ref1 = reference_forward(x1, params)
    assert out1.shape == (B1, SIZE_ACTION)
    assert jnp.allclose(out1, ref1, atol=2e-2, rtol=2e-2)
    assert jnp.allclose(jnp.sum(out1, axis=-1), 1.0, atol=1e-4)

    # Case 2: ragged batch (one partial block, masked OOB writes), full f32.
    B2 = 100
    x2 = jax.random.normal(k_x2, (B2, SIZE_OB), jnp.float32)
    out2 = jax.block_until_ready(reinforce_forward(x2, params, use_bf16=False))
    ref2 = reference_forward(x2, params)
    assert out2.shape == (B2, SIZE_ACTION)
    assert jnp.allclose(out2, ref2, atol=2e-3, rtol=2e-3)
    assert jnp.allclose(jnp.sum(out2, axis=-1), 1.0, atol=1e-4)

    # Case 3: single observation (typical RL action-selection call).
    ob = x2[0]
    p = jax.block_until_ready(reinforce_forward(ob, params, use_bf16=False))
    assert p.shape == (SIZE_ACTION,)
    assert jnp.allclose(p, ref2[0], atol=2e-3, rtol=2e-3)

    print("KERNEL_OK")
</pallas_src>

<mosaic_0001>
module attributes {stable_mosaic.version = 11 : i64} {
  func.func @_reinforce_kernel(%arg0: i32, %arg1: memref<256x16xf32, #tpu.memory_space<vmem>>, %arg2: memref<32x16xbf16, #tpu.memory_space<vmem>>, %arg3: memref<1x32xf32, #tpu.memory_space<vmem>>, %arg4: memref<32x32xbf16, #tpu.memory_space<vmem>>, %arg5: memref<1x32xf32, #tpu.memory_space<vmem>>, %arg6: memref<8x32xbf16, #tpu.memory_space<vmem>>, %arg7: memref<1x8xf32, #tpu.memory_space<vmem>>, %arg8: memref<256x8xf32, #tpu.memory_space<vmem>>) attributes {dimension_semantics = [#tpu.dimension_semantics<parallel>], iteration_bounds = array<i64: 2>, scalar_prefetch = 0 : i64, scratch_operands = 0 : i64, tpu.core_type = #tpu.core_type<tc>, window_params = [{transform_indices = @transform_0, window_bounds = array<i64: 256, 16>}, {pipeline_mode = #tpu.pipeline_mode<synchronous>, transform_indices = @transform_1, window_bounds = array<i64: 32, 16>}, {pipeline_mode = #tpu.pipeline_mode<synchronous>, transform_indices = @transform_2, window_bounds = array<i64: 1, 32>}, {pipeline_mode = #tpu.pipeline_mode<synchronous>, transform_indices = @transform_3, window_bounds = array<i64: 32, 32>}, {pipeline_mode = #tpu.pipeline_mode<synchronous>, transform_indices = @transform_4, window_bounds = array<i64: 1, 32>}, {pipeline_mode = #tpu.pipeline_mode<synchronous>, transform_indices = @transform_5, window_bounds = array<i64: 8, 32>}, {pipeline_mode = #tpu.pipeline_mode<synchronous>, transform_indices = @transform_6, window_bounds = array<i64: 1, 8>}, {transform_indices = @transform_7, window_bounds = array<i64: 256, 8>}]} {
    %c0 = arith.constant 0 : index
    %c0_0 = arith.constant 0 : index
    %0 = vector.load %arg1[%c0, %c0_0] : memref<256x16xf32, #tpu.memory_space<vmem>>, vector<256x16xf32>
    %1 = arith.truncf %0 : vector<256x16xf32> to vector<256x16xbf16>
    %c0_1 = arith.constant 0 : index
    %c0_2 = arith.constant 0 : index
    %2 = vector.load %arg2[%c0_1, %c0_2] : memref<32x16xbf16, #tpu.memory_space<vmem>>, vector<32x16xbf16>
    %cst = arith.constant dense<0.000000e+00> : vector<256x32xf32>
    %3 = tpu.matmul %1, %2, %cst {dimension_numbers = #tpu.dot_dimension_numbers<[1], [1], [0], [0], [0, 0, 1, 0], [], []>} : vector<256x16xbf16>, vector<32x16xbf16>, vector<256x32xf32> -> vector<256x32xf32>
    %c0_3 = arith.constant 0 : index
    %c0_4 = arith.constant 0 : index
    %4 = vector.load %arg3[%c0_3, %c0_4] : memref<1x32xf32, #tpu.memory_space<vmem>>, vector<1x32xf32>
    %5 = vector.broadcast %4 : vector<1x32xf32> to vector<256x32xf32>
    %6 = arith.addf %3, %5 : vector<256x32xf32>
    %cst_5 = arith.constant 0.000000e+00 : f32
    %7 = vector.broadcast %cst_5 : f32 to vector<256x32xf32>
    %8 = arith.maximumf %6, %7 : vector<256x32xf32>
    %9 = arith.truncf %8 : vector<256x32xf32> to vector<256x32xbf16>
    %c0_6 = arith.constant 0 : index
    %c0_7 = arith.constant 0 : index
    %10 = vector.load %arg4[%c0_6, %c0_7] : memref<32x32xbf16, #tpu.memory_space<vmem>>, vector<32x32xbf16>
    %cst_8 = arith.constant dense<0.000000e+00> : vector<256x32xf32>
    %11 = tpu.matmul %9, %10, %cst_8 {dimension_numbers = #tpu.dot_dimension_numbers<[1], [1], [0], [0], [0, 0, 1, 0], [], []>} : vector<256x32xbf16>, vector<32x32xbf16>, vector<256x32xf32> -> vector<256x32xf32>
    %c0_9 = arith.constant 0 : index
    %c0_10 = arith.constant 0 : index
    %12 = vector.load %arg5[%c0_9, %c0_10] : memref<1x32xf32, #tpu.memory_space<vmem>>, vector<1x32xf32>
    %13 = vector.broadcast %12 : vector<1x32xf32> to vector<256x32xf32>
    %14 = arith.addf %11, %13 : vector<256x32xf32>
    %cst_11 = arith.constant 0.000000e+00 : f32
    %15 = vector.broadcast %cst_11 : f32 to vector<256x32xf32>
    %16 = arith.maximumf %14, %15 : vector<256x32xf32>
    %17 = arith.truncf %16 : vector<256x32xf32> to vector<256x32xbf16>
    %c0_12 = arith.constant 0 : index
    %c0_13 = arith.constant 0 : index
    %18 = vector.load %arg6[%c0_12, %c0_13] : memref<8x32xbf16, #tpu.memory_space<vmem>>, vector<8x32xbf16>
    %cst_14 = arith.constant dense<0.000000e+00> : vector<256x8xf32>
    %19 = tpu.matmul %17, %18, %cst_14 {dimension_numbers = #tpu.dot_dimension_numbers<[1], [1], [0], [0], [0, 0, 1, 0], [], []>} : vector<256x32xbf16>, vector<8x32xbf16>, vector<256x8xf32> -> vector<256x8xf32>
    %c0_15 = arith.constant 0 : index
    %c0_16 = arith.constant 0 : index
    %20 = vector.load %arg7[%c0_15, %c0_16] : memref<1x8xf32, #tpu.memory_space<vmem>>, vector<1x8xf32>
    %21 = vector.broadcast %20 : vector<1x8xf32> to vector<256x8xf32>
    %22 = arith.addf %19, %21 : vector<256x8xf32>
    %cst_17 = arith.constant dense<0xFF800000> : vector<256xf32>
    %23 = vector.multi_reduction <maximumf>, %22, %cst_17 [1] : vector<256x8xf32> to vector<256xf32>
    %24 = vector.shape_cast %23 : vector<256xf32> to vector<256x1xf32>
    %25 = vector.broadcast %24 : vector<256x1xf32> to vector<256x8xf32>
    %26 = arith.subf %22, %25 : vector<256x8xf32>
    %27 = math.exp %26 : vector<256x8xf32>
    %cst_18 = arith.constant dense<0.000000e+00> : vector<256xf32>
    %28 = vector.multi_reduction <add>, %27, %cst_18 [1] : vector<256x8xf32> to vector<256xf32>
    %29 = vector.shape_cast %28 : vector<256xf32> to vector<256x1xf32>
    %30 = vector.broadcast %29 : vector<256x1xf32> to vector<256x8xf32>
    %31 = arith.divf %27, %30 : vector<256x8xf32>
    %c0_19 = arith.constant 0 : index
    %c0_20 = arith.constant 0 : index
    %32 = vector.load %arg8[%c0_19, %c0_20] : memref<256x8xf32, #tpu.memory_space<vmem>>, vector<256x8xf32>
    tpu.vector_store %arg8[%c0_19, %c0_20], %31 {strides = array<i32>} : memref<256x8xf32, #tpu.memory_space<vmem>>, vector<256x8xf32>,
    return
  }
  func.func @transform_0(%arg0: i32) -> (i32, i32) {
    %c0_i32 = arith.constant 0 : i32
    %c0_i32_0 = arith.constant 0 : i32
    return %arg0, %c0_i32 : i32, i32
  }
  func.func @transform_1(%arg0: i32) -> (i32, i32) {
    %c0_i32 = arith.constant 0 : i32
    %c0_i32_0 = arith.constant 0 : i32
    %c0_i32_1 = arith.constant 0 : i32
    return %c0_i32, %c0_i32_0 : i32, i32
  }
  func.func @transform_2(%arg0: i32) -> (i32, i32) {
    %c0_i32 = arith.constant 0 : i32
    %c0_i32_0 = arith.constant 0 : i32
    %c0_i32_1 = arith.constant 0 : i32
    return %c0_i32, %c0_i32_0 : i32, i32
  }
  func.func @transform_3(%arg0: i32) -> (i32, i32) {
    %c0_i32 = arith.constant 0 : i32
    %c0_i32_0 = arith.constant 0 : i32
    %c0_i32_1 = arith.constant 0 : i32
    return %c0_i32, %c0_i32_0 : i32, i32
  }
  func.func @transform_4(%arg0: i32) -> (i32, i32) {
    %c0_i32 = arith.constant 0 : i32
    %c0_i32_0 = arith.constant 0 : i32
    %c0_i32_1 = arith.constant 0 : i32
    return %c0_i32, %c0_i32_0 : i32, i32
  }
  func.func @transform_5(%arg0: i32) -> (i32, i32) {
    %c0_i32 = arith.constant 0 : i32
    %c0_i32_0 = arith.constant 0 : i32
    %c0_i32_1 = arith.constant 0 : i32
    return %c0_i32, %c0_i32_0 : i32, i32
  }
  func.func @transform_6(%arg0: i32) -> (i32, i32) {
    %c0_i32 = arith.constant 0 : i32
    %c0_i32_0 = arith.constant 0 : i32
    %c0_i32_1 = arith.constant 0 : i32
    return %c0_i32, %c0_i32_0 : i32, i32
  }
  func.func @transform_7(%arg0: i32) -> (i32, i32) {
    %c0_i32 = arith.constant 0 : i32
    %c0_i32_0 = arith.constant 0 : i32
    return %arg0, %c0_i32 : i32, i32
  }
}

</mosaic_0001>

<bundles_post_ra>
// kernel: reinforce_forward.1
= control target key start
LH: loop header
LB: loop body
LE: loop exit
PB: predicated region body
PF: predicated region fallthrough
CT: control target
= control target key end

     0   :  { %s1986_s24 = smov 0   ;;  %s2625_s0 = inlined_call_operand.vmem [shape: f32[512,16], index: 0, kind: input, shape index: {}]   ;;  %s2626_s1 = inlined_call_operand.vmem [shape: bf16[32,16], index: 1, kind: input, shape index: {}]   ;;  %s2627_s2 = inlined_call_operand.vmem [shape: f32[1,32], index: 2, kind: input, shape index: {}]   ;;  %s2628_s3 = inlined_call_operand.vmem [shape: bf16[32,32], index: 3, kind: input, shape index: {}]   ;;  %s2629_s4 = inlined_call_operand.vmem [shape: f32[1,32], index: 4, kind: input, shape index: {}]   ;;  %s2630_s5 = inlined_call_operand.vmem [shape: bf16[8,32], index: 5, kind: input, shape index: {}]   ;;  %s2631_s6 = inlined_call_operand.vmem [shape: f32[1,8], index: 6, kind: input, shape index: {}]   ;;  %s2632_s7 = inlined_call_operand.vmem [shape: f32[512,8], index: 7, kind: output, shape index: {}]  }
   0x1 LB: > { %s1562_s25 = sadd.s32 4294967295, %s1944_s24   ;;  %p1566_p0 = scmp.ge.s32.totalorder %s1944_s24, 1  ;;  %s1944_s24 = sphi %s1986_s24, %s17_s24  }
   0x2   : > { %p238_p1 = scmp.lt.s32.totalorder %s1944_s24, 3 }
   0x4   : > { %p239_p2 = pnand %p1566_p0, %p238_p1 }
   0x5   : > { %v1806_v0 = vld [vmem:[%s2626_s1] sm:$0xff] (!%p239_p2)   ;;  %vm352_vm0 = vcmask (!%p239_p2), 130048   ;;  %v1807_v1 = vld [vmem:[%s2626_s1 + $0x8] sm:$0xff] (!%p239_p2)   ;;  %s1567_s30 = sshll.u32 (!%p239_p2), %s1562_s25, 5  ;;  %vm637_vm1 = vcmask (!%p239_p2), 261120   ;;  %vm1121_vm2 = vcmask (!%p239_p2), 64512  }
   0x6   : > { %242 = sbr.rel (%p239_p2) target bundleno = 1059 (0x423), region = 48  ;;  %1791 = vmatprep.subr.msk.bf16.mxu0 (!%p239_p2), %vm352_vm0, %v1806_v0  ;;  %v402_v2 = vsel (!%p239_p2), %vm352_vm0, %v1806_v0, 0  ;;  %p271_p3 = scmp.lt.s32.totalorder (!%p239_p2), %s1567_s30, 63  ;;  %1792 = vmatprep.subr.msk.bf16.mxu1 (!%p239_p2), %vm352_vm0, %v1806_v0  ;;  %v405_v3 = vsel (!%p239_p2), %vm352_vm0, %v1807_v1, 0  ;;  %v1808_v7 = vld [vmem:[%s2628_s3] sm:$0xff] (!%p239_p2)   ;;  %v1809_v24 = vld [vmem:[%s2628_s3 + $0x8] sm:$0xff] (!%p239_p2)  }
   0x7   : > { %1682 = vmatpush3.bf16.xpose.msra.mxu0 (!%p239_p2), %v402_v2  ;;  %1789 = vmatpush3.bf16.xpose.msra.mxu1 (!%p239_p2), %v402_v2  ;;  %v687_v23 = vsel (!%p239_p2), %vm637_vm1, %v1808_v7, 0  ;;  %v690_v37 = vsel (!%p239_p2), %vm637_vm1, %v1809_v24, 0  ;;  %v901_v56 = vld [vmem:[%s2630_s5] sm:$0xf] (!%p239_p2) }
   0x8   : > { %1793 = vmatprep.subr.msk.bf16.mxu0 (!%p239_p2), %vm352_vm0, %v1807_v1  ;;  %1794 = vmatprep.subr.msk.bf16.mxu1 (!%p239_p2), %vm352_vm0, %v1807_v1  ;;  %v958_v57 = vsel (!%p239_p2), %vm637_vm1, %v901_v56, 0  ;;  %v2082_v58 = vld [vmem:[%s2627_s2] ss:$0 sm:$0xff] (!%p239_p2) }
   0xd   : > { %s2634_s30 = smov (!%p271_p3, %s1567_s30), 63 }
   0xe   : > { %s1568_s8 = sshll.u32 %s2634_s30, 3 }
   0xf   : > { %s2013_s11 = scalar_lea.vmem %s2625_s0, %s1568_s8  ;;  %1684 = vmatpush3.bf16.xpose.msra.mxu0 %v405_v3  ;;  %1790 = vmatpush3.bf16.xpose.msra.mxu1 %v405_v3  ;;  %s2524_s27 = scalar_lea.vmem %s2632_s7, %s1568_s8 }
  0x10   : > { %v283_v4 = vld [vmem:[%s2013_s11] sm:$0xff]  ;;  %v284_v5 = vld [vmem:[%s2013_s11 + $0x8] sm:$0xff]  ;;  %v285_v8 = vld [vmem:[%s2013_s11 + $0x10] sm:$0xff]  ;;  %1795 = vmatprep.subr.msk.bf16.mxu1 %vm637_vm1, %v1808_v7  ;;  %1797 = vmatprep.subr.msk.bf16.mxu0 %vm637_vm1, %v901_v56 }
  0x11   : > { %v315_v6 = vpack.c.bf16 %v284_v5, %v283_v4  ;;  %v286_v9 = vld [vmem:[%s2013_s11 + $0x18] sm:$0xff]  ;;  %v287_v10 = vld [vmem:[%s2013_s11 + $0x20] sm:$0xff]  ;;  %v288_v11 = vld [vmem:[%s2013_s11 + $0x28] sm:$0xff] }
  0x12   : > { %v299_v12 = vld [vmem:[%s2013_s11 + $0x80] sm:$0xff]  ;;  %v300_v13 = vld [vmem:[%s2013_s11 + $0x88] sm:$0xff]  ;;  %v316_v14 = vpack.c.bf16 %v286_v9, %v285_v8  ;;  %v301_v16 = vld [vmem:[%s2013_s11 + $0x90] sm:$0xff]  ;;  %v317_v19 = vpack.c.bf16 %v288_v11, %v287_v10 }
  0x13   : > { %1685 = vmatprep.mubr.msk.bf16.mxu0 %vm352_vm0, %v315_v6  ;;  %v323_v15 = vpack.c.bf16 %v300_v13, %v299_v12  ;;  %v302_v17 = vld [vmem:[%s2013_s11 + $0x98] sm:$0xff]  ;;  %v303_v18 = vld [vmem:[%s2013_s11 + $0xa0] sm:$0xff]  ;;  %v304_v21 = vld [vmem:[%s2013_s11 + $0xa8] sm:$0xff] }
  0x14   : > { %v324_v20 = vpack.c.bf16 %v302_v17, %v301_v16  ;;  %v325_v22 = vpack.c.bf16 %v304_v21, %v303_v18  ;;  %v289_v25 = vld [vmem:[%s2013_s11 + $0x30] sm:$0xff]  ;;  %v290_v26 = vld [vmem:[%s2013_s11 + $0x38] sm:$0xff]  ;;  %v291_v27 = vld [vmem:[%s2013_s11 + $0x40] sm:$0xff] }
  0x15   : > { %1701 = vmatprep.mubr.msk.bf16.mxu1 %vm352_vm0, %v323_v15  ;;  %v292_v28 = vld [vmem:[%s2013_s11 + $0x48] sm:$0xff]  ;;  %v305_v29 = vld [vmem:[%s2013_s11 + $0xb0] sm:$0xff]  ;;  %v306_v30 = vld [vmem:[%s2013_s11 + $0xb8] sm:$0xff]  ;;  %v318_v33 = vpack.c.bf16 %v290_v26, %v289_v25 }
  0x16   : > { %1686 = vmatmul.mubr.msk.bf16.vlgmr.msra.gmra.mrb[0].mxu0 %vm352_vm0, %v316_v14  ;;  %1702 = vmatmul.mubr.msk.bf16.vlgmr.msra.gmra.mrb[0].mxu1 %vm352_vm0, %v324_v20  ;;  %v307_v31 = vld [vmem:[%s2013_s11 + $0xc0] sm:$0xff]  ;;  %v308_v32 = vld [vmem:[%s2013_s11 + $0xc8] sm:$0xff]  ;;  %v319_v34 = vpack.c.bf16 %v292_v28, %v291_v27  ;;  %v326_v35 = vpack.c.bf16 %v306_v30, %v305_v29  ;;  %v293_v38 = vld [vmem:[%s2013_s11 + $0x50] sm:$0xff] }
  0x17   : > { %1689 = vmatprep.mubr.msk.bf16.mxu0 %vm352_vm0, %v317_v19  ;;  %1705 = vmatprep.mubr.msk.bf16.mxu1 %vm352_vm0, %v325_v22  ;;  %v327_v36 = vpack.c.bf16 %v308_v32, %v307_v31  ;;  %v294_v39 = vld [vmem:[%s2013_s11 + $0x58] sm:$0xff]  ;;  %v295_v40 = vld [vmem:[%s2013_s11 + $0x60] sm:$0xff]  ;;  %v296_v41 = vld [vmem:[%s2013_s11 + $0x68] sm:$0xff] }
  0x18   : > { %1718 = vmatpush3.bf16.xpose.msra.mxu1 %v687_v23  ;;  %v309_v42 = vld [vmem:[%s2013_s11 + $0xd0] sm:$0xff]  ;;  %v310_v43 = vld [vmem:[%s2013_s11 + $0xd8] sm:$0xff]  ;;  %v311_v44 = vld [vmem:[%s2013_s11 + $0xe0] sm:$0xff]  ;;  %v320_v46 = vpack.c.bf16 %v294_v39, %v293_v38  ;;  %v321_v47 = vpack.c.bf16 %v296_v41, %v295_v40  ;;  %1754 = vmatpush3.bf16.xpose.msra.mxu0 %v958_v57 }
  0x19   : > { %1796 = vmatprep.subr.msk.bf16.mxu1 %vm637_vm1, %v1809_v24  ;;  %v312_v45 = vld [vmem:[%s2013_s11 + $0xe8] sm:$0xff]  ;;  %v328_v48 = vpack.c.bf16 %v310_v43, %v309_v42  ;;  %v297_v50 = vld [vmem:[%s2013_s11 + $0x70] sm:$0xff]  ;;  %v298_v51 = vld [vmem:[%s2013_s11 + $0x78] sm:$0xff] }
  0x1a   : > { %v329_v49 = vpack.c.bf16 %v312_v45, %v311_v44  ;;  %v313_v52 = vld [vmem:[%s2013_s11 + $0xf0] sm:$0xff]  ;;  %v314_v53 = vld [vmem:[%s2013_s11 + $0xf8] sm:$0xff]  ;;  %v322_v54 = vpack.c.bf16 %v298_v51, %v297_v50 }
  0x1b   : > { %v330_v55 = vpack.c.bf16 %v314_v53, %v313_v52 }
  0x1e   : > { %1690 = vmatmul.mubr.msk.bf16.gmra.mrb[4].mxu0 %vm352_vm0, %v318_v33  ;;  %1706 = vmatmul.mubr.msk.bf16.gmra.mrb[4].mxu1 %vm352_vm0, %v326_v35 }
  0x1f   : > { %1693 = vmatprep.mubr.msk.bf16.mxu0 %vm352_vm0, %v319_v34  ;;  %1709 = vmatprep.mubr.msk.bf16.mxu1 %vm352_vm0, %v327_v36 }
  0x20   : > { %1720 = vmatpush3.bf16.xpose.msra.mxu1 %v690_v37 }
  0x26   : > { %1694 = vmatmul.mubr.msk.bf16.gmra.mrb[8].mxu0 %vm352_vm0, %v320_v46  ;;  %1710 = vmatmul.mubr.msk.bf16.gmra.mrb[8].mxu1 %vm352_vm0, %v328_v48 }
  0x27   : > { %1697 = vmatprep.mubr.msk.bf16.mxu0 %vm352_vm0, %v321_v47  ;;  %1713 = vmatprep.mubr.msk.bf16.mxu1 %vm352_vm0, %v329_v49 }
  0x2e   : > { %1698 = vmatmul.mubr.msk.bf16.gmra.mrb[12].mxu0 %vm352_vm0, %v322_v54  ;;  %1714 = vmatmul.mubr.msk.bf16.gmra.mrb[12].mxu1 %vm352_vm0, %v330_v55 }
  0xe9   : > { %v1687_v59 = vpop.f32.mrb[0].mxu0  ;;  %v1703_v62 = vpop.f32.mrb[0].mxu1 }
  0xea   : > { %v450_v60 = vadd.f32 %v1687_v59, %v2082_v58  ;;  %v441_v61 = vpop.f32.mrb[1].mxu0  ;;  %v514_v1 = vadd.f32 %v1703_v62, %v2082_v58  ;;  %v505_v2 = vpop.f32.mrb[1].mxu1 }
  0xeb   : > { %v442_v63 = vadd.f32 %v2082_v58, %v441_v61  ;;  %v1688_v0 = vpop.f32.mrb[2].mxu0  ;;  %v506_v5 = vadd.f32 %v2082_v58, %v505_v2  ;;  %v1704_v6 = vpop.f32.mrb[2].mxu1 }
  0xec   : > { %v453_v3 = vadd.f32 %v1688_v0, %v2082_v58  ;;  %v444_v4 = vpop.f32.mrb[3].mxu0  ;;  %v586_v8 = vmax.f32 %v514_v1, 0.0  ;;  %v517_v9 = vadd.f32 %v1704_v6, %v2082_v58  ;;  %v508_v10 = vpop.f32.mrb[3].mxu1  ;;  %v570_v11 = vmax.f32 %v450_v60, 0.0 }
  0xed   : > { %v445_v7 = vadd.f32 %v2082_v58, %v444_v4  ;;  %v584_v13 = vmax.f32 %v506_v5, 0.0  ;;  %v509_v14 = vadd.f32 %v2082_v58, %v508_v10  ;;  %v568_v15 = vmax.f32 %v442_v63, 0.0 }
  0xee   : > { %v571_v12 = vmax.f32 %v453_v3, 0.0  ;;  %v587_v17 = vmax.f32 %v517_v9, 0.0 }
  0xef   : > { %v569_v16 = vmax.f32 %v445_v7, 0.0  ;;  %v585_v19 = vmax.f32 %v509_v14, 0.0 }
  0xf0   : > { %v601_v18 = vpack.c.bf16 %v571_v12, %v570_v11  ;;  %v2092_v22 = vpack.c.bf16 %v587_v17, %v586_v8 }
  0xf1   : > { %v600_v20 = vpack.c.bf16 %v569_v16, %v568_v15  ;;  %v1691_v21 = vpop.f32.mrb[4].mxu0  ;;  %v2095_v25 = vpack.c.bf16 %v585_v19, %v584_v13  ;;  %v1707_v26 = vpop.f32.mrb[4].mxu1 }
  0xf2   : > { %v466_v23 = vadd.f32 %v1691_v21, %v2082_v58  ;;  %v457_v24 = vpop.f32.mrb[5].mxu0  ;;  %v530_v29 = vadd.f32 %v1707_v26, %v2082_v58  ;;  %v521_v30 = vpop.f32.mrb[5].mxu1 }
  0xf3   : > { %v458_v27 = vadd.f32 %v2082_v58, %v457_v24  ;;  %v1692_v28 = vpop.f32.mrb[6].mxu0  ;;  %1721 = vmatprep.mubr.msk.bf16.mxu1 %vm637_vm1, %v600_v20  ;;  %v522_v34 = vadd.f32 %v2082_v58, %v521_v30  ;;  %v1708_v35 = vpop.f32.mrb[6].mxu1 }
  0xf4   : > { %v574_v31 = vmax.f32 %v466_v23, 0.0  ;;  %v469_v32 = vadd.f32 %v1692_v28, %v2082_v58  ;;  %v460_v33 = vpop.f32.mrb[7].mxu0  ;;  %1722 = vmatmul.mubr.msk.bf16.vlgmr.msra.gmra.mrb[16].mxu1 %vm637_vm1, %v601_v18  ;;  %v590_v37 = vmax.f32 %v530_v29, 0.0  ;;  %v533_v38 = vadd.f32 %v1708_v35, %v2082_v58  ;;  %v524_v39 = vpop.f32.mrb[7].mxu1 }
  0xf5   : > { %v461_v36 = vadd.f32 %v2082_v58, %v460_v33  ;;  %v588_v41 = vmax.f32 %v522_v34, 0.0  ;;  %v525_v42 = vadd.f32 %v2082_v58, %v524_v39  ;;  %v572_v43 = vmax.f32 %v458_v27, 0.0 }
  0xf6   : > { %v575_v40 = vmax.f32 %v469_v32, 0.0  ;;  %v591_v45 = vmax.f32 %v533_v38, 0.0 }
  0xf7   : > { %v573_v44 = vmax.f32 %v461_v36, 0.0  ;;  %v589_v47 = vmax.f32 %v525_v42, 0.0 }
  0xf8   : > { %v603_v46 = vpack.c.bf16 %v575_v40, %v574_v31  ;;  %v2106_v50 = vpack.c.bf16 %v591_v45, %v590_v37 }
  0xf9   : > { %v602_v48 = vpack.c.bf16 %v573_v44, %v572_v43  ;;  %v1695_v49 = vpop.f32.mrb[8].mxu0  ;;  %v610_v53 = vpack.c.bf16 %v589_v47, %v588_v41  ;;  %v1711_v54 = vpop.f32.mrb[8].mxu1 }
  0xfa   : > { %v482_v51 = vadd.f32 %v1695_v49, %v2082_v58  ;;  %v473_v52 = vpop.f32.mrb[9].mxu0  ;;  %v546_v57 = vadd.f32 %v1711_v54, %v2082_v58  ;;  %v537_v59 = vpop.f32.mrb[9].mxu1 }
  0xfb   : > { %v474_v55 = vadd.f32 %v2082_v58, %v473_v52  ;;  %v1696_v56 = vpop.f32.mrb[10].mxu0  ;;  %1725 = vmatprep.mubr.msk.bf16.mxu1 %vm637_vm1, %v602_v48  ;;  %v538_v63 = vadd.f32 %v2082_v58, %v537_v59  ;;  %v1712_v0 = vpop.f32.mrb[10].mxu1 }
  0xfc   : > { %v578_v60 = vmax.f32 %v482_v51, 0.0  ;;  %v485_v61 = vadd.f32 %v1696_v56, %v2082_v58  ;;  %v476_v62 = vpop.f32.mrb[11].mxu0  ;;  %1726 = vmatmul.mubr.msk.bf16.gmra.mrb[20].mxu1 %vm637_vm1, %v603_v46  ;;  %v594_v2 = vmax.f32 %v546_v57, 0.0  ;;  %v549_v3 = vadd.f32 %v1712_v0, %v2082_v58  ;;  %v540_v4 = vpop.f32.mrb[11].mxu1 }
  0xfd   : > { %v477_v1 = vadd.f32 %v2082_v58, %v476_v62  ;;  %v592_v6 = vmax.f32 %v538_v63, 0.0  ;;  %v541_v7 = vadd.f32 %v2082_v58, %v540_v4  ;;  %v576_v8 = vmax.f32 %v474_v55, 0.0 }
  0xfe   : > { %v579_v5 = vmax.f32 %v485_v61, 0.0  ;;  %v595_v10 = vmax.f32 %v549_v3, 0.0 }
  0xff   : > { %v577_v9 = vmax.f32 %v477_v1, 0.0  ;;  %v593_v12 = vmax.f32 %v541_v7, 0.0 }
 0x100   : > { %v605_v11 = vpack.c.bf16 %v579_v5, %v578_v60  ;;  %v613_v15 = vpack.c.bf16 %v595_v10, %v594_v2 }
 0x101   : > { %v604_v13 = vpack.c.bf16 %v577_v9, %v576_v8  ;;  %v1699_v14 = vpop.f32.mrb[12].mxu0  ;;  %v612_v18 = vpack.c.bf16 %v593_v12, %v592_v6  ;;  %v1715_v19 = vpop.f32.mrb[12].mxu1 }
 0x102   : > { %v498_v16 = vadd.f32 %v1699_v14, %v2082_v58  ;;  %v489_v17 = vpop.f32.mrb[13].mxu0  ;;  %v562_v23 = vadd.f32 %v1715_v19, %v2082_v58  ;;  %v553_v24 = vpop.f32.mrb[13].mxu1 }
 0x103   : > { %v490_v20 = vadd.f32 %v2082_v58, %v489_v17  ;;  %v1700_v21 = vpop.f32.mrb[14].mxu0  ;;  %1729 = vmatprep.mubr.msk.bf16.mxu1 %vm637_vm1, %v604_v13  ;;  %v554_v29 = vadd.f32 %v2082_v58, %v553_v24  ;;  %v1716_v30 = vpop.f32.mrb[14].mxu1 }
 0x104   : > { %v582_v26 = vmax.f32 %v498_v16, 0.0  ;;  %v501_v27 = vadd.f32 %v1700_v21, %v2082_v58  ;;  %v492_v28 = vpop.f32.mrb[15].mxu0  ;;  %1730 = vmatmul.mubr.msk.bf16.gmra.mrb[24].mxu1 %vm637_vm1, %v605_v11  ;;  %v598_v32 = vmax.f32 %v562_v23, 0.0  ;;  %v565_v33 = vadd.f32 %v1716_v30, %v2082_v58  ;;  %v556_v34 = vpop.f32.mrb[15].mxu1 }
 0x105   : > { %v493_v31 = vadd.f32 %v2082_v58, %v492_v28  ;;  %v596_v36 = vmax.f32 %v554_v29, 0.0  ;;  %v557_v37 = vadd.f32 %v2082_v58, %v556_v34  ;;  %v580_v38 = vmax.f32 %v490_v20, 0.0  ;;  %v2144_v58 = vld [vmem:[%s2629_s4] ss:$0 sm:$0xff] }
 0x106   : > { %v583_v35 = vmax.f32 %v501_v27, 0.0  ;;  %v599_v40 = vmax.f32 %v565_v33, 0.0 }
 0x107   : > { %v581_v39 = vmax.f32 %v493_v31, 0.0  ;;  %v597_v42 = vmax.f32 %v557_v37, 0.0 }
 0x108   : > { %v607_v41 = vpack.c.bf16 %v583_v35, %v582_v26  ;;  %v615_v44 = vpack.c.bf16 %v599_v40, %v598_v32 }
 0x109   : > { %v606_v43 = vpack.c.bf16 %v581_v39, %v580_v38  ;;  %v614_v45 = vpack.c.bf16 %v597_v42, %v596_v36 }
 0x10b   : > { %1733 = vmatprep.mubr.msk.bf16.mxu1 %vm637_vm1, %v606_v43 }
 0x10c   : > { %1734 = vmatmul.mubr.msk.bf16.gmra.mrb[28].mxu1 %vm637_vm1, %v607_v41 }
 0x10d   : > { %1737 = vmatprep.mubr.msk.bf16.mxu1 %vm637_vm1, %v2095_v25 }
 0x114   : > { %1738 = vmatmul.mubr.msk.bf16.gmra.mrb[32].mxu1 %vm637_vm1, %v2092_v22 }
 0x115   : > { %1741 = vmatprep.mubr.msk.bf16.mxu1 %vm637_vm1, %v610_v53 }
 0x11c   : > { %1742 = vmatmul.mubr.msk.bf16.gmra.mrb[36].mxu1 %vm637_vm1, %v2106_v50 }
 0x11d   : > { %1745 = vmatprep.mubr.msk.bf16.mxu1 %vm637_vm1, %v612_v18 }
 0x124   : > { %1746 = vmatmul.mubr.msk.bf16.gmra.mrb[40].mxu1 %vm637_vm1, %v613_v15 }
 0x125   : > { %1749 = vmatprep.mubr.msk.bf16.mxu1 %vm637_vm1, %v614_v45 }
 0x12c   : > { %1750 = vmatmul.mubr.msk.bf16.gmra.mrb[44].mxu1 %vm637_vm1, %v615_v44 }
 0x1c7   : > { %v1723_v25 = vpop.f32.mrb[16].mxu1 }
 0x1c8   : > { %v735_v22 = vadd.f32 %v1723_v25, %v2144_v58  ;;  %v726_v46 = vpop.f32.mrb[17].mxu1 }
 0x1c9   : > { %v727_v47 = vadd.f32 %v2144_v58, %v726_v46  ;;  %v1724_v48 = vpop.f32.mrb[18].mxu1 }
 0x1ca   : > { %v738_v49 = vadd.f32 %v1724_v48, %v2144_v58  ;;  %v729_v50 = vpop.f32.mrb[19].mxu1  ;;  %v855_v52 = vmax.f32 %v735_v22, 0.0 }
 0x1cb   : > { %v730_v51 = vadd.f32 %v2144_v58, %v729_v50  ;;  %v853_v54 = vmax.f32 %v727_v47, 0.0 }
 0x1cc   : > { %v856_v53 = vmax.f32 %v738_v49, 0.0 }
 0x1cd   : > { %v854_v55 = vmax.f32 %v730_v51, 0.0 }
 0x1ce   : > { %v886_v56 = vpack.c.bf16 %v856_v53, %v855_v52 }
 0x1cf   : > { %v885_v57 = vpack.c.bf16 %v854_v55, %v853_v54  ;;  %v1727_v59 = vpop.f32.mrb[20].mxu1 }
 0x1d0   : > { %v751_v60 = vadd.f32 %v1727_v59, %v2144_v58  ;;  %v742_v61 = vpop.f32.mrb[21].mxu1 }
 0x1d1   : > { %v743_v62 = vadd.f32 %v2144_v58, %v742_v61  ;;  %v1728_v63 = vpop.f32.mrb[22].mxu1  ;;  %1755 = vmatprep.mubr.msk.bf16.mxu0 %vm637_vm1, %v885_v57 }
 0x1d2   : > { %v754_v0 = vadd.f32 %v1728_v63, %v2144_v58  ;;  %v745_v1 = vpop.f32.mrb[23].mxu1  ;;  %1756 = vmatmul.mubr.msk.bf16.vlgmr.msra.gmra.mrb[16].mxu0 %vm637_vm1, %v886_v56  ;;  %v859_v3 = vmax.f32 %v751_v60, 0.0 }
 0x1d3   : > { %v746_v2 = vadd.f32 %v2144_v58, %v745_v1  ;;  %v857_v5 = vmax.f32 %v743_v62, 0.0 }
 0x1d4   : > { %v860_v4 = vmax.f32 %v754_v0, 0.0 }
 0x1d5   : > { %v858_v6 = vmax.f32 %v746_v2, 0.0 }
 0x1d6   : > { %v888_v7 = vpack.c.bf16 %v860_v4, %v859_v3 }
 0x1d7   : > { %v887_v8 = vpack.c.bf16 %v858_v6, %v857_v5  ;;  %v1731_v9 = vpop.f32.mrb[24].mxu1 }
 0x1d8   : > { %v767_v10 = vadd.f32 %v1731_v9, %v2144_v58  ;;  %v758_v11 = vpop.f32.mrb[25].mxu1 }
 0x1d9   : > { %v759_v12 = vadd.f32 %v2144_v58, %v758_v11  ;;  %v1732_v13 = vpop.f32.mrb[26].mxu1  ;;  %1759 = vmatprep.mubr.msk.bf16.mxu0 %vm637_vm1, %v887_v8 }
 0x1da   : > { %v770_v14 = vadd.f32 %v1732_v13, %v2144_v58  ;;  %v761_v15 = vpop.f32.mrb[27].mxu1  ;;  %1760 = vmatmul.mubr.msk.bf16.gmra.mrb[20].mxu0 %vm637_vm1, %v888_v7  ;;  %v863_v17 = vmax.f32 %v767_v10, 0.0 }
 0x1db   : > { %v762_v16 = vadd.f32 %v2144_v58, %v761_v15  ;;  %v861_v19 = vmax.f32 %v759_v12, 0.0 }
 0x1dc   : > { %v864_v18 = vmax.f32 %v770_v14, 0.0 }
 0x1dd   : > { %v862_v20 = vmax.f32 %v762_v16, 0.0 }
 0x1de   : > { %v890_v21 = vpack.c.bf16 %v864_v18, %v863_v17 }
 0x1df   : > { %v889_v23 = vpack.c.bf16 %v862_v20, %v861_v19  ;;  %v1735_v24 = vpop.f32.mrb[28].mxu1 }
 0x1e0   : > { %v783_v26 = vadd.f32 %v1735_v24, %v2144_v58  ;;  %v774_v27 = vpop.f32.mrb[29].mxu1 }
 0x1e1   : > { %v775_v28 = vadd.f32 %v2144_v58, %v774_v27  ;;  %v1736_v29 = vpop.f32.mrb[30].mxu1  ;;  %1763 = vmatprep.mubr.msk.bf16.mxu0 %vm637_vm1, %v889_v23 }
 0x1e2   : > { %v786_v30 = vadd.f32 %v1736_v29, %v2144_v58  ;;  %v777_v31 = vpop.f32.mrb[31].mxu1  ;;  %1764 = vmatmul.mubr.msk.bf16.gmra.mrb[24].mxu0 %vm637_vm1, %v890_v21  ;;  %v867_v33 = vmax.f32 %v783_v26, 0.0 }
 0x1e3   : > { %v778_v32 = vadd.f32 %v2144_v58, %v777_v31  ;;  %v865_v35 = vmax.f32 %v775_v28, 0.0 }
 0x1e4   : > { %v868_v34 = vmax.f32 %v786_v30, 0.0 }
 0x1e5   : > { %v866_v36 = vmax.f32 %v778_v32, 0.0  ;;  %v2197_v32 = vld [vmem:[%s2631_s6] ss:$0 sm:$0xff] }
 0x1e6   : > { %v892_v37 = vpack.c.bf16 %v868_v34, %v867_v33 }
 0x1e7   : > { %v891_v38 = vpack.c.bf16 %v866_v36, %v865_v35  ;;  %v1739_v39 = vpop.f32.mrb[32].mxu1 }
 0x1e8   : > { %v799_v40 = vadd.f32 %v1739_v39, %v2144_v58  ;;  %v790_v41 = vpop.f32.mrb[33].mxu1 }
 0x1e9   : > { %v791_v42 = vadd.f32 %v2144_v58, %v790_v41  ;;  %v1740_v43 = vpop.f32.mrb[34].mxu1  ;;  %1767 = vmatprep.mubr.msk.bf16.mxu0 %vm637_vm1, %v891_v38 }
 0x1ea   : > { %v802_v44 = vadd.f32 %v1740_v43, %v2144_v58  ;;  %v793_v45 = vpop.f32.mrb[35].mxu1  ;;  %1768 = vmatmul.mubr.msk.bf16.gmra.mrb[28].mxu0 %vm637_vm1, %v892_v37  ;;  %v871_v22 = vmax.f32 %v799_v40, 0.0 }
 0x1eb   : > { %v794_v25 = vadd.f32 %v2144_v58, %v793_v45  ;;  %v869_v47 = vmax.f32 %v791_v42, 0.0 }
 0x1ec   : > { %v872_v46 = vmax.f32 %v802_v44, 0.0 }
 0x1ed   : > { %v870_v48 = vmax.f32 %v794_v25, 0.0 }
 0x1ee   : > { %v894_v49 = vpack.c.bf16 %v872_v46, %v871_v22 }
 0x1ef   : > { %v893_v50 = vpack.c.bf16 %v870_v48, %v869_v47  ;;  %v1743_v51 = vpop.f32.mrb[36].mxu1 }
 0x1f0   : > { %v815_v52 = vadd.f32 %v1743_v51, %v2144_v58  ;;  %v806_v53 = vpop.f32.mrb[37].mxu1 }
 0x1f1   : > { %v807_v54 = vadd.f32 %v2144_v58, %v806_v53  ;;  %v1744_v55 = vpop.f32.mrb[38].mxu1  ;;  %1771 = vmatprep.mubr.msk.bf16.mxu0 %vm637_vm1, %v893_v50 }
 0x1f2   : > { %v818_v56 = vadd.f32 %v1744_v55, %v2144_v58  ;;  %v809_v57 = vpop.f32.mrb[39].mxu1  ;;  %1772 = vmatmul.mubr.msk.bf16.gmra.mrb[32].mxu0 %vm637_vm1, %v894_v49  ;;  %v875_v60 = vmax.f32 %v815_v52, 0.0 }
 0x1f3   : > { %v810_v59 = vadd.f32 %v2144_v58, %v809_v57  ;;  %v873_v62 = vmax.f32 %v807_v54, 0.0 }
 0x1f4   : > { %v876_v61 = vmax.f32 %v818_v56, 0.0 }
 0x1f5   : > { %v874_v63 = vmax.f32 %v810_v59, 0.0 }
 0x1f6   : > { %v896_v0 = vpack.c.bf16 %v876_v61, %v875_v60 }
 0x1f7   : > { %v895_v1 = vpack.c.bf16 %v874_v63, %v873_v62  ;;  %v1747_v2 = vpop.f32.mrb[40].mxu1 }
 0x1f8   : > { %v831_v3 = vadd.f32 %v1747_v2, %v2144_v58  ;;  %v822_v4 = vpop.f32.mrb[41].mxu1 }
 0x1f9   : > { %v823_v5 = vadd.f32 %v2144_v58, %v822_v4  ;;  %v1748_v6 = vpop.f32.mrb[42].mxu1  ;;  %1775 = vmatprep.mubr.msk.bf16.mxu0 %vm637_vm1, %v895_v1 }
 0x1fa   : > { %v834_v7 = vadd.f32 %v1748_v6, %v2144_v58  ;;  %v825_v8 = vpop.f32.mrb[43].mxu1  ;;  %1776 = vmatmul.mubr.msk.bf16.gmra.mrb[36].mxu0 %vm637_vm1, %v896_v0  ;;  %v879_v10 = vmax.f32 %v831_v3, 0.0 }
 0x1fb   : > { %v826_v9 = vadd.f32 %v2144_v58, %v825_v8  ;;  %v877_v12 = vmax.f32 %v823_v5, 0.0 }
 0x1fc   : > { %v880_v11 = vmax.f32 %v834_v7, 0.0 }
 0x1fd   : > { %v878_v13 = vmax.f32 %v826_v9, 0.0 }
 0x1fe   : > { %v898_v14 = vpack.c.bf16 %v880_v11, %v879_v10 }
 0x1ff   : > { %v897_v15 = vpack.c.bf16 %v878_v13, %v877_v12  ;;  %v1751_v16 = vpop.f32.mrb[44].mxu1 }
 0x200   : > { %v847_v17 = vadd.f32 %v1751_v16, %v2144_v58  ;;  %v838_v18 = vpop.f32.mrb[45].mxu1 }
 0x201   : > { %v839_v19 = vadd.f32 %v2144_v58, %v838_v18  ;;  %v1752_v20 = vpop.f32.mrb[46].mxu1  ;;  %1779 = vmatprep.mubr.msk.bf16.mxu0 %vm637_vm1, %v897_v15 }
 0x202   : > { %v850_v21 = vadd.f32 %v1752_v20, %v2144_v58  ;;  %v841_v23 = vpop.f32.mrb[47].mxu1  ;;  %1780 = vmatmul.mubr.msk.bf16.gmra.mrb[40].mxu0 %vm637_vm1, %v898_v14  ;;  %v883_v26 = vmax.f32 %v847_v17, 0.0 }
 0x203   : > { %v842_v24 = vadd.f32 %v2144_v58, %v841_v23  ;;  %v881_v28 = vmax.f32 %v839_v19, 0.0 }
 0x204   : > { %v884_v27 = vmax.f32 %v850_v21, 0.0 }
 0x205   : > { %v882_v29 = vmax.f32 %v842_v24, 0.0 }
 0x206   : > { %v900_v30 = vpack.c.bf16 %v884_v27, %v883_v26 }
 0x207   : > { %v899_v31 = vpack.c.bf16 %v882_v29, %v881_v28 }
 0x209   : > { %1783 = vmatprep.mubr.msk.bf16.mxu0 %vm637_vm1, %v899_v31 }
 0x20a   : > { %1784 = vmatmul.mubr.msk.bf16.gmra.mrb[44].mxu0 %vm637_vm1, %v900_v30 }
 0x2a5   : > { %v1757_v33 = vpop.f32.mrb[16].mxu0 }
 0x2a6   : > { %v2200_v34 = vadd.f32 %v1757_v33, %v2197_v32  ;;  %v994_v58 = vpop.f32.mrb[17].mxu0 }
 0x2a7   : > { %v2203_v35 = vadd.f32 %v2197_v32, %v994_v58  ;;  %v1758_v36 = vpop.f32.mrb[18].mxu0 }
 0x2a8   : > { %v2206_v37 = vadd.f32 %v1758_v36, %v2197_v32  ;;  %v997_v38 = vpop.f32.mrb[19].mxu0  ;;  %v1128_v39 = vsel %vm1121_vm2, %v2200_v34, -inf }
 0x2a9   : > { %v2211_v40 = vadd.f32 %v2197_v32, %v997_v38  ;;  %1129 = vmax.xlane.f32.xlu1 %v1128_v39  ;;  %v1122_v41 = vsel %vm1121_vm2, %v2203_v35, -inf }
 0x2aa   : > { %1123 = vmax.xlane.f32.xlu0 %v1122_v41  ;;  %v1131_v42 = vsel %vm1121_vm2, %v2206_v37, -inf }
 0x2ab   : > { %v1125_v44 = vsel %vm1121_vm2, %v2211_v40, -inf }
 0x2ad   : > { %1132 = vmax.xlane.f32.xlu1 %v1131_v42  ;;  %v1761_v43 = vpop.f32.mrb[20].mxu0 }
 0x2ae   : > { %v2220_v45 = vadd.f32 %v1761_v43, %v2197_v32  ;;  %v1010_v25 = vpop.f32.mrb[21].mxu0  ;;  %1126 = vmax.xlane.f32.xlu0 %v1125_v44 }
 0x2af   : > { %v1762_v22 = vpop.f32.mrb[22].mxu0  ;;  %v2228_v49 = vadd.f32 %v2197_v32, %v1010_v25 }
 0x2b0   : > { %v2223_v46 = vadd.f32 %v1762_v22, %v2197_v32  ;;  %v1013_v47 = vpop.f32.mrb[23].mxu0  ;;  %v1140_v48 = vsel %vm1121_vm2, %v2220_v45, -inf }
 0x2b1   : > { %v2231_v50 = vadd.f32 %v2197_v32, %v1013_v47  ;;  %v1134_v53 = vsel %vm1121_vm2, %v2228_v49, -inf }
 0x2b2   : > { %1141 = vmax.xlane.f32.xlu0 %v1140_v48  ;;  %v1143_v51 = vsel %vm1121_vm2, %v2223_v46, -inf }
 0x2b3   : > { %1144 = vmax.xlane.f32.xlu1 %v1143_v51  ;;  %v1137_v56 = vsel %vm1121_vm2, %v2231_v50, -inf }
 0x2b5   : > { %v1765_v52 = vpop.f32.mrb[24].mxu0 }
 0x2b6   : > { %v2238_v54 = vadd.f32 %v1765_v52, %v2197_v32  ;;  %v1026_v55 = vpop.f32.mrb[25].mxu0  ;;  %1135 = vmax.xlane.f32.xlu0 %v1134_v53 }
 0x2b7   : > { %v1766_v57 = vpop.f32.mrb[26].mxu0  ;;  %1138 = vmax.xlane.f32.xlu1 %v1137_v56  ;;  %v2248_v62 = vadd.f32 %v2197_v32, %v1026_v55 }
 0x2b8   : > { %v2243_v59 = vadd.f32 %v1766_v57, %v2197_v32  ;;  %v1029_v60 = vpop.f32.mrb[27].mxu0  ;;  %v1152_v61 = vsel %vm1121_vm2, %v2238_v54, -inf }
 0x2b9   : > { %v2251_v63 = vadd.f32 %v2197_v32, %v1029_v60  ;;  %v1146_v2 = vsel %vm1121_vm2, %v2248_v62, -inf }
 0x2ba   : > { %1153 = vmax.xlane.f32.xlu0 %v1152_v61  ;;  %v1155_v0 = vsel %vm1121_vm2, %v2243_v59, -inf }
 0x2bb   : > { %1156 = vmax.xlane.f32.xlu1 %v1155_v0  ;;  %v1149_v5 = vsel %vm1121_vm2, %v2251_v63, -inf }
 0x2bd   : > { %v1769_v1 = vpop.f32.mrb[28].mxu0 }
 0x2be   : > { %v2258_v3 = vadd.f32 %v1769_v1, %v2197_v32  ;;  %v1042_v4 = vpop.f32.mrb[29].mxu0  ;;  %1147 = vmax.xlane.f32.xlu0 %v1146_v2 }
 0x2bf   : > { %v1770_v6 = vpop.f32.mrb[30].mxu0  ;;  %1150 = vmax.xlane.f32.xlu1 %v1149_v5  ;;  %v2268_v10 = vadd.f32 %v2197_v32, %v1042_v4 }
 0x2c0   : > { %v2263_v7 = vadd.f32 %v1770_v6, %v2197_v32  ;;  %v1045_v8 = vpop.f32.mrb[31].mxu0  ;;  %v1164_v9 = vsel %vm1121_vm2, %v2258_v3, -inf }
 0x2c1   : > { %v2271_v11 = vadd.f32 %v2197_v32, %v1045_v8  ;;  %v1158_v14 = vsel %vm1121_vm2, %v2268_v10, -inf }
 0x2c2   : > { %1165 = vmax.xlane.f32.xlu0 %v1164_v9  ;;  %v1167_v12 = vsel %vm1121_vm2, %v2263_v7, -inf }
 0x2c3   : > { %1168 = vmax.xlane.f32.xlu1 %v1167_v12  ;;  %v1161_v17 = vsel %vm1121_vm2, %v2271_v11, -inf }
 0x2c5   : > { %v1773_v13 = vpop.f32.mrb[32].mxu0 }
 0x2c6   : > { %v2278_v15 = vadd.f32 %v1773_v13, %v2197_v32  ;;  %v1058_v16 = vpop.f32.mrb[33].mxu0  ;;  %1159 = vmax.xlane.f32.xlu0 %v1158_v14 }
 0x2c7   : > { %v1774_v18 = vpop.f32.mrb[34].mxu0  ;;  %1162 = vmax.xlane.f32.xlu1 %v1161_v17  ;;  %v2288_v23 = vadd.f32 %v2197_v32, %v1058_v16 }
 0x2c8   : > { %v2283_v19 = vadd.f32 %v1774_v18, %v2197_v32  ;;  %v1061_v20 = vpop.f32.mrb[35].mxu0  ;;  %v1176_v21 = vsel %vm1121_vm2, %v2278_v15, -inf }
 0x2c9   : > { %v2291_v24 = vadd.f32 %v2197_v32, %v1061_v20  ;;  %v1170_v28 = vsel %vm1121_vm2, %v2288_v23, -inf }
 0x2ca   : > { %1177 = vmax.xlane.f32.xlu0 %v1176_v21  ;;  %v1179_v26 = vsel %vm1121_vm2, %v2283_v19, -inf }
 0x2cb   : > { %1180 = vmax.xlane.f32.xlu1 %v1179_v26  ;;  %v1173_v31 = vsel %vm1121_vm2, %v2291_v24, -inf }
 0x2cd   : > { %v1777_v27 = vpop.f32.mrb[36].mxu0 }
 0x2ce   : > { %v2298_v29 = vadd.f32 %v1777_v27, %v2197_v32  ;;  %v1074_v30 = vpop.f32.mrb[37].mxu0  ;;  %1171 = vmax.xlane.f32.xlu0 %v1170_v28 }
 0x2cf   : > { %v1778_v33 = vpop.f32.mrb[38].mxu0  ;;  %1174 = vmax.xlane.f32.xlu1 %v1173_v31  ;;  %v2308_v39 = vadd.f32 %v2197_v32, %v1074_v30 }
 0x2d0   : > { %v2303_v58 = vadd.f32 %v1778_v33, %v2197_v32  ;;  %v1077_v36 = vpop.f32.mrb[39].mxu0  ;;  %v1188_v38 = vsel %vm1121_vm2, %v2298_v29, -inf }
 0x2d1   : > { %v2311_v41 = vadd.f32 %v2197_v32, %v1077_v36  ;;  %v1182_v44 = vsel %vm1121_vm2, %v2308_v39, -inf }
 0x2d2   : > { %1189 = vmax.xlane.f32.xlu0 %v1188_v38  ;;  %v1191_v42 = vsel %vm1121_vm2, %v2303_v58, -inf }
 0x2d3   : > { %1192 = vmax.xlane.f32.xlu1 %v1191_v42  ;;  %v1185_v47 = vsel %vm1121_vm2, %v2311_v41, -inf }
 0x2d5   : > { %v1781_v43 = vpop.f32.mrb[40].mxu0 }
 0x2d6   : > { %v2318_v25 = vadd.f32 %v1781_v43, %v2197_v32  ;;  %v1090_v22 = vpop.f32.mrb[41].mxu0  ;;  %1183 = vmax.xlane.f32.xlu0 %v1182_v44 }
 0x2d7   : > { %v1782_v48 = vpop.f32.mrb[42].mxu0  ;;  %1186 = vmax.xlane.f32.xlu1 %v1185_v47  ;;  %v2328_v55 = vadd.f32 %v2197_v32, %v1090_v22 }
 0x2d8   : > { %v2323_v51 = vadd.f32 %v1782_v48, %v2197_v32  ;;  %v1093_v52 = vpop.f32.mrb[43].mxu0  ;;  %v1200_v53 = vsel %vm1121_vm2, %v2318_v25, -inf }
 0x2d9   : > { %v2331_v56 = vadd.f32 %v2197_v32, %v1093_v52  ;;  %v1194_v61 = vsel %vm1121_vm2, %v2328_v55, -inf }
 0x2da   : > { %1201 = vmax.xlane.f32.xlu0 %v1200_v53  ;;  %v1203_v57 = vsel %vm1121_vm2, %v2323_v51, -inf }
 0x2db   : > { %1204 = vmax.xlane.f32.xlu1 %v1203_v57  ;;  %v1197_v1 = vsel %vm1121_vm2, %v2331_v56, -inf }
 0x2dd   : > { %v1785_v60 = vpop.f32.mrb[44].mxu0 }
 0x2de   : > { %v1106_v0 = vpop.f32.mrb[45].mxu0  ;;  %1195 = vmax.xlane.f32.xlu0 %v1194_v61  ;;  %v2343_v6 = vadd.f32 %v1785_v60, %v2197_v32 }
 0x2df   : > { %v2340_v2 = vadd.f32 %v2197_v32, %v1106_v0  ;;  %v1786_v4 = vpop.f32.mrb[46].mxu0  ;;  %1198 = vmax.xlane.f32.xlu1 %v1197_v1 }
 0x2e0   : > { %v1109_v5 = vpop.f32.mrb[47].mxu0  ;;  %v2351_v12 = vadd.f32 %v1786_v4, %v2197_v32  ;;  %v1212_v14 = vsel %vm1121_vm2, %v2343_v6, -inf }
 0x2e1   : > { %v2346_v8 = vadd.f32 %v2197_v32, %v1109_v5  ;;  %v1206_v9 = vsel %vm1121_vm2, %v2340_v2, -inf }
 0x2e2   : > { %1207 = vmax.xlane.f32.xlu0 %v1206_v9  ;;  %v1215_v16 = vsel %vm1121_vm2, %v2351_v12, -inf }
 0x2e3   : > { %v1209_v13 = vsel %vm1121_vm2, %v2346_v8, -inf }
 0x2e4   : > { %1210 = vmax.xlane.f32.xlu1 %v1209_v13 }
 0x2e6   : > { %1213 = vmax.xlane.f32.xlu0 %v1212_v14 }
 0x2e8   : > { %1216 = vmax.xlane.f32.xlu1 %v1215_v16 }
 0x336   : > { %v1130_v17 = vpop.xlane.xlu1 %1129 }
 0x337   : > { %v1220_v18 = vsub.f32 %v2200_v34, %v1130_v17  ;;  %v1124_v20 = vpop.xlane.xlu0 %1123 }
 0x338   : > { %v1218_v21 = vsub.f32 %v2203_v35, %v1124_v20 }
 0x339   : > { %v1254_v32 = vmul.f32 1.442695, %v1220_v18 }
 0x33a   : > { %v1250_v26 = vmul.f32 1.442695, %v1218_v21  ;;  %v1133_v27 = vpop.xlane.xlu1 %1132 }
 0x33b   : > { %1810 = vpow2.f32 %v1254_v32  ;;  %v1221_v28 = vsub.f32 %v2206_v37, %v1133_v27  ;;  %v1127_v30 = vpop.xlane.xlu0 %1126 }
 0x33c   : > { %v1219_v31 = vsub.f32 %v2211_v40, %v1127_v30  ;;  %1812 = vpow2.f32 %v1250_v26 }
 0x33d   : > { %v1256_v33 = vmul.f32 1.442695, %v1221_v28 }
 0x33e   : > { %v1252_v36 = vmul.f32 1.442695, %v1219_v31 }
 0x33f   : > { %1814 = vpow2.f32 %v1256_v33  ;;  %v1142_v38 = vpop.xlane.xlu0 %1141 }
 0x340   : > { %v1224_v42 = vsub.f32 %v2220_v45, %v1142_v38  ;;  %v1145_v34 = vpop.xlane.xlu1 %1144  ;;  %1816 = vpow2.f32 %v1252_v36 }
 0x341   : > { %v1225_v35 = vsub.f32 %v2223_v46, %v1145_v34 }
 0x342   : > { %v1262_v43 = vmul.f32 1.442695, %v1224_v42 }
 0x343   : > { %v1264_v44 = vmul.f32 1.442695, %v1225_v35  ;;  %v1136_v22 = vpop.xlane.xlu0 %1135 }
 0x344   : > { %1818 = vpow2.f32 %v1262_v43  ;;  %v1222_v37 = vsub.f32 %v2228_v49, %v1136_v22  ;;  %v1139_v47 = vpop.xlane.xlu1 %1138 }
 0x345   : > { %v2366_v48 = vpop.eup %1810  ;;  %1820 = vpow2.f32 %v1264_v44  ;;  %v1223_v40 = vsub.f32 %v2231_v50, %v1139_v47 }
 0x346   : > { %v1258_v52 = vmul.f32 1.442695, %v1222_v37  ;;  %v1320_v45 = vsel %vm1121_vm2, %v2366_v48, 0.0  ;;  %v2371_v53 = vpop.eup %1812 }
 0x347   : > { %v1260_v57 = vmul.f32 1.442695, %v1223_v40  ;;  %1321 = vadd.xlane.f32.xlu0 %v1320_v45  ;;  %v1154_v46 = vpop.xlane.xlu0 %1153  ;;  %v1314_v4 = vsel %vm1121_vm2, %v2371_v53, 0.0 }
 0x348   : > { %1822 = vpow2.f32 %v1258_v52  ;;  %v1228_v60 = vsub.f32 %v2238_v54, %v1154_v46  ;;  %v1157_v61 = vpop.xlane.xlu1 %1156 }
 0x349   : > { %v2374_v49 = vpop.eup %1814  ;;  %1824 = vpow2.f32 %v1260_v57  ;;  %v1229_v0 = vsub.f32 %v2243_v59, %v1157_v61 }
 0x34a   : > { %v1270_v1 = vmul.f32 1.442695, %v1228_v60  ;;  %v1323_v50 = vsel %vm1121_vm2, %v2374_v49, 0.0  ;;  %v2381_v5 = vpop.eup %1816 }
 0x34b   : > { %v1272_v9 = vmul.f32 1.442695, %v1229_v0  ;;  %1324 = vadd.xlane.f32.xlu1 %v1323_v50  ;;  %1315 = vadd.xlane.f32.xlu0 %v1314_v4  ;;  %v1148_v13 = vpop.xlane.xlu0 %1147  ;;  %v1317_v18 = vsel %vm1121_vm2, %v2381_v5, 0.0 }
 0x34c   : > { %1826 = vpow2.f32 %v1270_v1  ;;  %v1226_v54 = vsub.f32 %v2248_v62, %v1148_v13  ;;  %v1151_v14 = vpop.xlane.xlu1 %1150 }
 0x34d   : > { %1828 = vpow2.f32 %v1272_v9  ;;  %v1227_v59 = vsub.f32 %v2251_v63, %v1151_v14 }
 0x34e   : > { %v2385_v16 = vpop.eup %1818  ;;  %v1266_v17 = vmul.f32 1.442695, %v1226_v54 }
 0x34f   : > { %v2389_v20 = vpop.eup %1820  ;;  %v1268_v21 = vmul.f32 1.442695, %v1227_v59  ;;  %1318 = vadd.xlane.f32.xlu1 %v1317_v18  ;;  %v1166_v32 = vpop.xlane.xlu0 %1165  ;;  %v1332_v26 = vsel %vm1121_vm2, %v2385_v16, 0.0 }
 0x350   : > { %1830 = vpow2.f32 %v1266_v17  ;;  %v1232_v62 = vsub.f32 %v2258_v3, %v1166_v32  ;;  %v1169_v27 = vpop.xlane.xlu1 %1168  ;;  %1333 = vadd.xlane.f32.xlu0 %v1332_v26  ;;  %v1335_v31 = vsel %vm1121_vm2, %v2389_v20, 0.0 }
 0x351   : > { %1832 = vpow2.f32 %v1268_v21  ;;  %v1233_v63 = vsub.f32 %v2263_v7, %v1169_v27 }
 0x352   : > { %v2395_v28 = vpop.eup %1822  ;;  %v1278_v30 = vmul.f32 1.442695, %v1232_v62 }
 0x353   : > { %v2399_v33 = vpop.eup %1824  ;;  %v1280_v36 = vmul.f32 1.442695, %v1233_v63  ;;  %1336 = vadd.xlane.f32.xlu1 %v1335_v31  ;;  %v1160_v38 = vpop.xlane.xlu0 %1159  ;;  %v1326_v42 = vsel %vm1121_vm2, %v2395_v28, 0.0 }
 0x354   : > { %1834 = vpow2.f32 %v1278_v30  ;;  %v1230_v3 = vsub.f32 %v2268_v10, %v1160_v38  ;;  %v1163_v34 = vpop.xlane.xlu1 %1162  ;;  %1327 = vadd.xlane.f32.xlu0 %v1326_v42  ;;  %v1329_v44 = vsel %vm1121_vm2, %v2399_v33, 0.0 }
 0x355   : > { %1836 = vpow2.f32 %v1280_v36  ;;  %v1231_v7 = vsub.f32 %v2271_v11, %v1163_v34 }
 0x356   : > { %v2405_v35 = vpop.eup %1826  ;;  %v1274_v43 = vmul.f32 1.442695, %v1230_v3 }
 0x357   : > { %v2409_v22 = vpop.eup %1828  ;;  %v1276_v37 = vmul.f32 1.442695, %v1231_v7  ;;  %1330 = vadd.xlane.f32.xlu1 %v1329_v44  ;;  %v1178_v47 = vpop.xlane.xlu0 %1177  ;;  %v1344_v40 = vsel %vm1121_vm2, %v2405_v35, 0.0 }
 0x358   : > { %1838 = vpow2.f32 %v1274_v43  ;;  %v1236_v10 = vsub.f32 %v2278_v15, %v1178_v47  ;;  %v1181_v52 = vpop.xlane.xlu1 %1180  ;;  %1345 = vadd.xlane.f32.xlu0 %v1344_v40  ;;  %v1347_v46 = vsel %vm1121_vm2, %v2409_v22, 0.0 }
 0x359   : > { %1840 = vpow2.f32 %v1276_v37  ;;  %v1237_v11 = vsub.f32 %v2283_v19, %v1181_v52 }
 0x35a   : > { %v2415_v45 = vpop.eup %1830  ;;  %v1286_v57 = vmul.f32 1.442695, %v1236_v10 }
 0x35b   : > { %v2419_v60 = vpop.eup %1832  ;;  %v1288_v61 = vmul.f32 1.442695, %v1237_v11  ;;  %1348 = vadd.xlane.f32.xlu1 %v1347_v46  ;;  %v1172_v0 = vpop.xlane.xlu0 %1171  ;;  %v1338_v1 = vsel %vm1121_vm2, %v2415_v45, 0.0 }
 0x35c   : > { %1842 = vpow2.f32 %v1286_v57  ;;  %v1234_v15 = vsub.f32 %v2288_v23, %v1172_v0  ;;  %v1175_v50 = vpop.xlane.xlu1 %1174  ;;  %1339 = vadd.xlane.f32.xlu0 %v1338_v1  ;;  %v1341_v13 = vsel %vm1121_vm2, %v2419_v60, 0.0 }
 0x35d   : > { %1844 = vpow2.f32 %v1288_v61  ;;  %v1235_v19 = vsub.f32 %v2291_v24, %v1175_v50 }
 0x35e   : > { %v2425_v4 = vpop.eup %1834  ;;  %v1282_v9 = vmul.f32 1.442695, %v1234_v15 }
 0x35f   : > { %v2429_v54 = vpop.eup %1836  ;;  %v1284_v14 = vmul.f32 1.442695, %v1235_v19  ;;  %1342 = vadd.xlane.f32.xlu1 %v1341_v13  ;;  %v1190_v59 = vpop.xlane.xlu0 %1189  ;;  %v1356_v17 = vsel %vm1121_vm2, %v2425_v4, 0.0 }
 0x360   : > { %1846 = vpow2.f32 %v1282_v9  ;;  %v1240_v23 = vsub.f32 %v2298_v29, %v1190_v59  ;;  %v1193_v18 = vpop.xlane.xlu1 %1192  ;;  %1357 = vadd.xlane.f32.xlu0 %v1356_v17  ;;  %v1359_v26 = vsel %vm1121_vm2, %v2429_v54, 0.0 }
 0x361   : > { %1848 = vpow2.f32 %v1284_v14  ;;  %v1241_v24 = vsub.f32 %v2303_v58, %v1193_v18 }
 0x362   : > { %v2435_v21 = vpop.eup %1838  ;;  %v1294_v32 = vmul.f32 1.442695, %v1240_v23 }
 0x363   : > { %v2439_v62 = vpop.eup %1840  ;;  %v1296_v27 = vmul.f32 1.442695, %v1241_v24  ;;  %1360 = vadd.xlane.f32.xlu1 %v1359_v26  ;;  %v1184_v63 = vpop.xlane.xlu0 %1183  ;;  %v1350_v30 = vsel %vm1121_vm2, %v2435_v21, 0.0 }
 0x364   : > { %1850 = vpow2.f32 %v1294_v32  ;;  %v1238_v29 = vsub.f32 %v2308_v39, %v1184_v63  ;;  %v1187_v31 = vpop.xlane.xlu1 %1186  ;;  %1351 = vadd.xlane.f32.xlu0 %v1350_v30  ;;  %v1353_v42 = vsel %vm1121_vm2, %v2439_v62, 0.0 }
 0x365   : > { %1852 = vpow2.f32 %v1296_v27  ;;  %v1239_v58 = vsub.f32 %v2311_v41, %v1187_v31 }
 0x366   : > { %v2445_v36 = vpop.eup %1842  ;;  %v1290_v38 = vmul.f32 1.442695, %v1238_v29 }
 0x367   : > { %v2449_v3 = vpop.eup %1844  ;;  %v1292_v34 = vmul.f32 1.442695, %v1239_v58  ;;  %1354 = vadd.xlane.f32.xlu1 %v1353_v42  ;;  %v1202_v7 = vpop.xlane.xlu0 %1201  ;;  %v1368_v43 = vsel %vm1121_vm2, %v2445_v36, 0.0 }
 0x368   : > { %1854 = vpow2.f32 %v1290_v38  ;;  %v1244_v39 = vsub.f32 %v2318_v25, %v1202_v7  ;;  %v1205_v44 = vpop.xlane.xlu1 %1204  ;;  %1369 = vadd.xlane.f32.xlu0 %v1368_v43  ;;  %v1371_v40 = vsel %vm1121_vm2, %v2449_v3, 0.0 }
 0x369   : > { %1856 = vpow2.f32 %v1292_v34  ;;  %v1245_v41 = vsub.f32 %v2323_v51, %v1205_v44 }
 0x36a   : > { %v2455_v37 = vpop.eup %1846  ;;  %v1302_v47 = vmul.f32 1.442695, %v1244_v39 }
 0x36b   : > { %v2459_v10 = vpop.eup %1848  ;;  %v1304_v52 = vmul.f32 1.442695, %v1245_v41  ;;  %1372 = vadd.xlane.f32.xlu1 %v1371_v40  ;;  %v1196_v11 = vpop.xlane.xlu0 %1195  ;;  %v1362_v57 = vsel %vm1121_vm2, %v2455_v37, 0.0 }
 0x36c   : > { %1858 = vpow2.f32 %v1302_v47  ;;  %v1242_v25 = vsub.f32 %v2328_v55, %v1196_v11  ;;  %v1199_v46 = vpop.xlane.xlu1 %1198  ;;  %1363 = vadd.xlane.f32.xlu0 %v1362_v57  ;;  %v1365_v1 = vsel %vm1121_vm2, %v2459_v10, 0.0 }
 0x36d   : > { %1860 = vpow2.f32 %v1304_v52  ;;  %v1243_v51 = vsub.f32 %v2331_v56, %v1199_v46 }
 0x36e   : > { %v2465_v61 = vpop.eup %1850  ;;  %v1298_v0 = vmul.f32 1.442695, %v1242_v25 }
 0x36f   : > { %v2469_v15 = vpop.eup %1852  ;;  %v1300_v50 = vmul.f32 1.442695, %v1243_v51  ;;  %1366 = vadd.xlane.f32.xlu1 %v1365_v1  ;;  %v1208_v19 = vpop.xlane.xlu0 %1207  ;;  %v1380_v9 = vsel %vm1121_vm2, %v2465_v61, 0.0 }
 0x370   : > { %1862 = vpow2.f32 %v1298_v0  ;;  %v1246_v55 = vsub.f32 %v2340_v2, %v1208_v19  ;;  %1381 = vadd.xlane.f32.xlu0 %v1380_v9  ;;  %v1383_v17 = vsel %vm1121_vm2, %v2469_v15, 0.0 }
 0x371   : > { %1864 = vpow2.f32 %v1300_v50  ;;  %v1211_v56 = vpop.xlane.xlu1 %1210 }
 0x372   : > { %v2474_v13 = vpop.eup %1854  ;;  %v1306_v14 = vmul.f32 1.442695, %v1246_v55  ;;  %v1247_v59 = vsub.f32 %v2346_v8, %v1211_v56 }
 0x373   : > { %v2479_v23 = vpop.eup %1856  ;;  %1384 = vadd.xlane.f32.xlu1 %v1383_v17  ;;  %v1214_v18 = vpop.xlane.xlu0 %1213  ;;  %v1374_v24 = vsel %vm1121_vm2, %v2474_v13, 0.0 }
 0x374   : > { %1866 = vpow2.f32 %v1306_v14  ;;  %v1308_v2 = vmul.f32 1.442695, %v1247_v59  ;;  %v1248_v32 = vsub.f32 %v2343_v6, %v1214_v18  ;;  %1375 = vadd.xlane.f32.xlu0 %v1374_v24  ;;  %v1377_v30 = vsel %vm1121_vm2, %v2479_v23, 0.0 }
 0x375   : > { %v1217_v26 = vpop.xlane.xlu1 %1216 }
 0x376   : > { %v2484_v27 = vpop.eup %1858  ;;  %1868 = vpow2.f32 %v1308_v2  ;;  %v1310_v8 = vmul.f32 1.442695, %v1248_v32  ;;  %v1249_v63 = vsub.f32 %v2351_v12, %v1217_v26 }
 0x377   : > { %v2489_v29 = vpop.eup %1860  ;;  %1378 = vadd.xlane.f32.xlu1 %v1377_v30  ;;  %v1392_v31 = vsel %vm1121_vm2, %v2484_v27, 0.0 }
 0x378   : > { %1870 = vpow2.f32 %v1310_v8  ;;  %v1312_v58 = vmul.f32 1.442695, %v1249_v63  ;;  %1393 = vadd.xlane.f32.xlu0 %v1392_v31  ;;  %v1395_v38 = vsel %vm1121_vm2, %v2489_v29, 0.0 }
 0x37a   : > { %v2493_v6 = vpop.eup %1862  ;;  %1872 = vpow2.f32 %v1312_v58 }
 0x37b   : > { %v2497_v42 = vpop.eup %1864  ;;  %1396 = vadd.xlane.f32.xlu1 %v1395_v38  ;;  %v1386_v12 = vsel %vm1121_vm2, %v2493_v6, 0.0 }
 0x37c   : > { %1387 = vadd.xlane.f32.xlu0 %v1386_v12  ;;  %v1389_v7 = vsel %vm1121_vm2, %v2497_v42, 0.0 }
 0x37e   : > { %v2501_v34 = vpop.eup %1866 }
 0x37f   : > { %1390 = vadd.xlane.f32.xlu1 %v1389_v7  ;;  %v1398_v43 = vsel %vm1121_vm2, %v2501_v34, 0.0 }
 0x380   : > { %v2507_v39 = vpop.eup %1868  ;;  %1399 = vadd.xlane.f32.xlu0 %v1398_v43 }
 0x381   : > { %v1401_v44 = vsel %vm1121_vm2, %v2507_v39, 0.0 }
 0x382   : > { %v2511_v41 = vpop.eup %1870 }
 0x383   : > { %1402 = vadd.xlane.f32.xlu1 %v1401_v44  ;;  %v1404_v47 = vsel %vm1121_vm2, %v2511_v41, 0.0 }
 0x384   : > { %v2515_v40 = vpop.eup %1872  ;;  %1405 = vadd.xlane.f32.xlu0 %v1404_v47 }
 0x385   : > { %v1407_v52 = vsel %vm1121_vm2, %v2515_v40, 0.0 }
 0x387   : > { %1408 = vadd.xlane.f32.xlu1 %v1407_v52 }
 0x3d4   : > { %v1322_v11 = vpop.xlane.xlu0 %1321 }
 0x3d5   : > { %1874 = vrcp.f32 %v1322_v11 }
 0x3d8   : > { %v1325_v57 = vpop.xlane.xlu1 %1324  ;;  %v1316_v25 = vpop.xlane.xlu0 %1315 }
 0x3d9   : > { %1876 = vrcp.f32 %v1325_v57 }
 0x3da   : > { %1878 = vrcp.f32 %v1316_v25 }
 0x3dc   : > { %v1319_v46 = vpop.xlane.xlu1 %1318 }
 0x3dd   : > { %1880 = vrcp.f32 %v1319_v46  ;;  %v1334_v51 = vpop.xlane.xlu0 %1333 }
 0x3de   : > { %1882 = vrcp.f32 %v1334_v51 }
 0x3df   : > { %v1875_v0 = vpop.eup %1874 }
 0x3e0   : > { %v1415_v1 = vmul.f32 %v1875_v0, %v2366_v48  ;;  %v1337_v50 = vpop.xlane.xlu1 %1336 }
 0x3e1   : > { %1884 = vrcp.f32 %v1337_v50  ;;  %v1328_v19 = vpop.xlane.xlu0 %1327 }
 0x3e2   : > { %1476 = vst.msk [vmem:[%s2524_s27 + $0x10] sm:$0xff] %vm1121_vm2, %v1415_v1  ;;  %1886 = vrcp.f32 %v1328_v19 }
 0x3e3   : > { %v1877_v9 = vpop.eup %1876 }
 0x3e4   : > { %v1879_v55 = vpop.eup %1878  ;;  %v1417_v56 = vmul.f32 %v1877_v9, %v2374_v49  ;;  %v1331_v14 = vpop.xlane.xlu1 %1330 }
 0x3e5   : > { %v1411_v59 = vmul.f32 %v1879_v55, %v2371_v53  ;;  %1888 = vrcp.f32 %v1331_v14  ;;  %v1346_v17 = vpop.xlane.xlu0 %1345 }
 0x3e6   : > { %1477 = vst.msk [vmem:[%s2524_s27 + $0x18] sm:$0xff] %vm1121_vm2, %v1417_v56  ;;  %1890 = vrcp.f32 %v1346_v17 }
 0x3e7   : > { %v1881_v48 = vpop.eup %1880  ;;  %1474 = vst.msk [vmem:[%s2524_s27] sm:$0xff] %vm1121_vm2, %v1411_v59 }
 0x3e8   : > { %v1883_v18 = vpop.eup %1882  ;;  %v1413_v24 = vmul.f32 %v1881_v48, %v2381_v5  ;;  %v1349_v2 = vpop.xlane.xlu1 %1348 }
 0x3e9   : > { %v1423_v32 = vmul.f32 %v1883_v18, %v2385_v16  ;;  %1892 = vrcp.f32 %v1349_v2  ;;  %v1340_v49 = vpop.xlane.xlu0 %1339 }
 0x3ea   : > { %1475 = vst.msk [vmem:[%s2524_s27 + $0x8] sm:$0xff] %vm1121_vm2, %v1413_v24  ;;  %1894 = vrcp.f32 %v1340_v49 }
 0x3eb   : > { %v1885_v53 = vpop.eup %1884  ;;  %1480 = vst.msk [vmem:[%s2524_s27 + $0x30] sm:$0xff] %vm1121_vm2, %v1423_v32 }
 0x3ec   : > { %v1887_v26 = vpop.eup %1886  ;;  %v1425_v8 = vmul.f32 %v1885_v53, %v2389_v20  ;;  %v1343_v63 = vpop.xlane.xlu1 %1342 }
 0x3ed   : > { %v1419_v30 = vmul.f32 %v1887_v26, %v2395_v28  ;;  %1896 = vrcp.f32 %v1343_v63  ;;  %v1358_v5 = vpop.xlane.xlu0 %1357 }
 0x3ee   : > { %1481 = vst.msk [vmem:[%s2524_s27 + $0x38] sm:$0xff] %vm1121_vm2, %v1425_v8  ;;  %1898 = vrcp.f32 %v1358_v5 }
 0x3ef   : > { %v1889_v16 = vpop.eup %1888  ;;  %1478 = vst.msk [vmem:[%s2524_s27 + $0x20] sm:$0xff] %vm1121_vm2, %v1419_v30 }
 0x3f0   : > { %v1891_v31 = vpop.eup %1890  ;;  %v1421_v58 = vmul.f32 %v1889_v16, %v2399_v33  ;;  %v1361_v38 = vpop.xlane.xlu1 %1360 }
 0x3f1   : > { %v1431_v12 = vmul.f32 %v1891_v31, %v2405_v35  ;;  %1900 = vrcp.f32 %v1361_v38  ;;  %v1352_v20 = vpop.xlane.xlu0 %1351 }
 0x3f2   : > { %1479 = vst.msk [vmem:[%s2524_s27 + $0x28] sm:$0xff] %vm1121_vm2, %v1421_v58  ;;  %1902 = vrcp.f32 %v1352_v20 }
 0x3f3   : > { %v1893_v28 = vpop.eup %1892  ;;  %1484 = vst.msk [vmem:[%s2524_s27 + $0x50] sm:$0xff] %vm1121_vm2, %v1431_v12 }
 0x3f4   : > { %v1895_v7 = vpop.eup %1894  ;;  %v1433_v43 = vmul.f32 %v1893_v28, %v2409_v22  ;;  %v1355_v44 = vpop.xlane.xlu1 %1354 }
 0x3f5   : > { %v1427_v47 = vmul.f32 %v1895_v7, %v2415_v45  ;;  %1904 = vrcp.f32 %v1355_v44  ;;  %v1370_v33 = vpop.xlane.xlu0 %1369 }
 0x3f6   : > { %1485 = vst.msk [vmem:[%s2524_s27 + $0x58] sm:$0xff] %vm1121_vm2, %v1433_v43  ;;  %1906 = vrcp.f32 %v1370_v33 }
 0x3f7   : > { %v1897_v35 = vpop.eup %1896  ;;  %1482 = vst.msk [vmem:[%s2524_s27 + $0x40] sm:$0xff] %vm1121_vm2, %v1427_v47 }
 0x3f8   : > { %v1899_v52 = vpop.eup %1898  ;;  %v1429_v11 = vmul.f32 %v1897_v35, %v2419_v60  ;;  %v1373_v57 = vpop.xlane.xlu1 %1372 }
 0x3f9   : > { %v1439_v25 = vmul.f32 %v1899_v52, %v2425_v4  ;;  %1908 = vrcp.f32 %v1373_v57  ;;  %v1364_v22 = vpop.xlane.xlu0 %1363 }
 0x3fa   : > { %1483 = vst.msk [vmem:[%s2524_s27 + $0x48] sm:$0xff] %vm1121_vm2, %v1429_v11  ;;  %1910 = vrcp.f32 %v1364_v22 }
 0x3fb   : > { %v1901_v45 = vpop.eup %1900  ;;  %1488 = vst.msk [vmem:[%s2524_s27 + $0x70] sm:$0xff] %vm1121_vm2, %v1439_v25 }
 0x3fc   : > { %v1903_v46 = vpop.eup %1902  ;;  %v1441_v51 = vmul.f32 %v1901_v45, %v2429_v54  ;;  %v1367_v0 = vpop.xlane.xlu1 %1366 }
 0x3fd   : > { %v1435_v1 = vmul.f32 %v1903_v46, %v2435_v21  ;;  %1912 = vrcp.f32 %v1367_v0  ;;  %v1382_v60 = vpop.xlane.xlu0 %1381 }
 0x3fe   : > { %1489 = vst.msk [vmem:[%s2524_s27 + $0x78] sm:$0xff] %vm1121_vm2, %v1441_v51  ;;  %1914 = vrcp.f32 %v1382_v60 }
 0x3ff   : > { %v1905_v4 = vpop.eup %1904  ;;  %1486 = vst.msk [vmem:[%s2524_s27 + $0x60] sm:$0xff] %vm1121_vm2, %v1435_v1 }
 0x400   : > { %v1907_v50 = vpop.eup %1906  ;;  %v1437_v19 = vmul.f32 %v1905_v4, %v2439_v62  ;;  %v1385_v9 = vpop.xlane.xlu1 %1384 }
 0x401   : > { %v1447_v55 = vmul.f32 %v1907_v50, %v2445_v36  ;;  %1916 = vrcp.f32 %v1385_v9  ;;  %v1376_v54 = vpop.xlane.xlu0 %1375 }
 0x402   : > { %1487 = vst.msk [vmem:[%s2524_s27 + $0x68] sm:$0xff] %vm1121_vm2, %v1437_v19  ;;  %1918 = vrcp.f32 %v1376_v54 }
 0x403   : > { %v1909_v21 = vpop.eup %1908  ;;  %1492 = vst.msk [vmem:[%s2524_s27 + $0x90] sm:$0xff] %vm1121_vm2, %v1447_v55 }
 0x404   : > { %v1911_v56 = vpop.eup %1910  ;;  %v1449_v14 = vmul.f32 %v1909_v21, %v2449_v3  ;;  %v1379_v59 = vpop.xlane.xlu1 %1378 }
 0x405   : > { %v1443_v17 = vmul.f32 %v1911_v56, %v2455_v37  ;;  %1920 = vrcp.f32 %v1379_v59  ;;  %v1394_v62 = vpop.xlane.xlu0 %1393 }
 0x406   : > { %1493 = vst.msk [vmem:[%s2524_s27 + $0x98] sm:$0xff] %vm1121_vm2, %v1449_v14  ;;  %1922 = vrcp.f32 %v1394_v62 }
 0x407   : > { %v1913_v36 = vpop.eup %1912  ;;  %1490 = vst.msk [vmem:[%s2524_s27 + $0x80] sm:$0xff] %vm1121_vm2, %v1443_v17 }
 0x408   : > { %v1915_v48 = vpop.eup %1914  ;;  %v1445_v18 = vmul.f32 %v1913_v36, %v2459_v10  ;;  %v1397_v24 = vpop.xlane.xlu1 %1396 }
 0x409   : > { %v1455_v2 = vmul.f32 %v1915_v48, %v2465_v61  ;;  %1924 = vrcp.f32 %v1397_v24  ;;  %v1388_v3 = vpop.xlane.xlu0 %1387 }
 0x40a   : > { %1491 = vst.msk [vmem:[%s2524_s27 + $0x88] sm:$0xff] %vm1121_vm2, %v1445_v18  ;;  %1926 = vrcp.f32 %v1388_v3 }
 0x40b   : > { %v1917_v37 = vpop.eup %1916  ;;  %1496 = vst.msk [vmem:[%s2524_s27 + $0xb0] sm:$0xff] %vm1121_vm2, %v1455_v2 }
 0x40c   : > { %v1919_v32 = vpop.eup %1918  ;;  %v1457_v49 = vmul.f32 %v1917_v37, %v2469_v15  ;;  %v1391_v53 = vpop.xlane.xlu1 %1390 }
 0x40d   : > { %v1451_v26 = vmul.f32 %v1919_v32, %v2474_v13  ;;  %1928 = vrcp.f32 %v1391_v53  ;;  %v1400_v10 = vpop.xlane.xlu0 %1399 }
 0x40e   : > { %1497 = vst.msk [vmem:[%s2524_s27 + $0xb8] sm:$0xff] %vm1121_vm2, %v1457_v49  ;;  %1930 = vrcp.f32 %v1400_v10 }
 0x40f   : > { %v1921_v61 = vpop.eup %1920  ;;  %1494 = vst.msk [vmem:[%s2524_s27 + $0xa0] sm:$0xff] %vm1121_vm2, %v1451_v26 }
 0x410   : > { %v1923_v8 = vpop.eup %1922  ;;  %v1453_v63 = vmul.f32 %v1921_v61, %v2479_v23  ;;  %v1403_v30 = vpop.xlane.xlu1 %1402 }
 0x411   : > { %v1463_v15 = vmul.f32 %v1923_v8, %v2484_v27  ;;  %1932 = vrcp.f32 %v1403_v30  ;;  %v1406_v5 = vpop.xlane.xlu0 %1405 }
 0x412   : > { %1495 = vst.msk [vmem:[%s2524_s27 + $0xa8] sm:$0xff] %vm1121_vm2, %v1453_v63  ;;  %1934 = vrcp.f32 %v1406_v5 }
 0x413   : > { %v1925_v13 = vpop.eup %1924  ;;  %1500 = vst.msk [vmem:[%s2524_s27 + $0xd0] sm:$0xff] %vm1121_vm2, %v1463_v15 }
 0x414   : > { %v1927_v16 = vpop.eup %1926  ;;  %v1465_v31 = vmul.f32 %v1925_v13, %v2489_v29  ;;  %v1409_v58 = vpop.xlane.xlu1 %1408 }
 0x415   : > { %v1459_v23 = vmul.f32 %v1927_v16, %v2493_v6  ;;  %1936 = vrcp.f32 %v1409_v58 }
 0x416   : > { %1501 = vst.msk [vmem:[%s2524_s27 + $0xd8] sm:$0xff] %vm1121_vm2, %v1465_v31 }
 0x417   : > { %v1929_v27 = vpop.eup %1928  ;;  %1498 = vst.msk [vmem:[%s2524_s27 + $0xc0] sm:$0xff] %vm1121_vm2, %v1459_v23 }
 0x418   : > { %v1931_v38 = vpop.eup %1930  ;;  %v1461_v12 = vmul.f32 %v1929_v27, %v2497_v42 }
 0x419   : > { %v1467_v20 = vmul.f32 %v1931_v38, %v2501_v34 }
 0x41a   : > { %1499 = vst.msk [vmem:[%s2524_s27 + $0xc8] sm:$0xff] %vm1121_vm2, %v1461_v12 }
 0x41b   : > { %v1933_v29 = vpop.eup %1932  ;;  %1502 = vst.msk [vmem:[%s2524_s27 + $0xe0] sm:$0xff] %vm1121_vm2, %v1467_v20 }
 0x41c   : > { %v1935_v28 = vpop.eup %1934  ;;  %v1469_v6 = vmul.f32 %v1933_v29, %v2507_v39 }
 0x41d   : > { %v1471_v7 = vmul.f32 %v1935_v28, %v2511_v41 }
 0x41e   : > { %1503 = vst.msk [vmem:[%s2524_s27 + $0xe8] sm:$0xff] %vm1121_vm2, %v1469_v6 }
 0x41f   : > { %v1937_v43 = vpop.eup %1936  ;;  %1504 = vst.msk [vmem:[%s2524_s27 + $0xf0] sm:$0xff] %vm1121_vm2, %v1471_v7 }
 0x420   : > { %v1473_v44 = vmul.f32 %v1937_v43, %v2515_v40 }
 0x422   : > { %1505 = vst.msk [vmem:[%s2524_s27 + $0xf8] sm:$0xff] %vm1121_vm2, %v1473_v44 }
 0x423 PF: > { %s17_s24 = sadd.s32 1, %s1944_s24  }
 0x424   : > { %p14_p4 = scmp.ge.s32.totalorder %s17_s24, 4  }
 0x426   :  { %16 = sbr.rel (!%p14_p4) target bundleno = 1 (0x1), region = 78 }

</bundles_post_ra>
